<compile_context>
chip_gen: v5e
topology: v5e:2x2
jax: 0.10.0
libtpu: 0.0.40
codegen_flags: <defaults>
</compile_context>

<pallas_src>
import functools

import jax
import jax.numpy as jnp
from jax.experimental import pallas as pl
from jax.experimental.pallas import tpu as pltpu

IN_DIM = 3 * 32 * 32   # 3072
H1 = 100
H2 = 25
OUT = 10

H1_PAD = 128           # 100 -> 128
H2_PAD = 128           # 25  -> 128
OUT_PAD = 128          # 10  -> 128


def _round_up(n, m):
    return ((n + m - 1) // m) * m


def _pad_to(a, shape):
    pads = [(0, s - d) for d, s in zip(a.shape, shape)]
    return jnp.pad(a, pads)


def _mlp_kernel(x_ref, w1_ref, b1_ref, w2_ref, b2_ref, w3_ref, b3_ref, o_ref):
    # x: (TB, 3072) bf16;  weights bf16;  biases f32;  output f32 (lane-padded).
    x = x_ref[...]

    h1 = jnp.dot(x, w1_ref[...], preferred_element_type=jnp.float32)
    h1 = jnp.maximum(h1 + b1_ref[...], 0.0)                     # (TB, 128) f32

    h2 = jnp.dot(h1.astype(jnp.bfloat16), w2_ref[...],
                 preferred_element_type=jnp.float32)
    h2 = jnp.maximum(h2 + b2_ref[...], 0.0)                     # (TB, 128) f32

    # TODO(synk): Dropout(0.1) is identity in eval mode; training-mode masking
    # would use pltpu.prng_seed + pltpu.prng_random_bits.

    out = jnp.dot(h2.astype(jnp.bfloat16), w3_ref[...],
                  preferred_element_type=jnp.float32)
    o_ref[...] = (out + b3_ref[...]).astype(o_ref.dtype)        # (TB, 128) f32


@functools.partial(jax.jit, static_argnames=("max_tile",))
def net_forward(x, params, max_tile=1024):
    """x: (B, 3072) float32.  params: dict of unpadded f32 weights/biases."""
    B = x.shape[0]

    # Batch tile: large enough to amortize per-step overhead and keep the
    # x-stream DMA busy, but never larger than the (8-row aligned) batch.
    TB = min(max_tile, _round_up(B, 8))
    B_pad = _round_up(B, TB)

    x_p = _pad_to(x, (B_pad, IN_DIM)).astype(jnp.bfloat16)

    # Lane-pad weights/biases (zero padding keeps the math exact).
    w1 = _pad_to(params["w1"], (IN_DIM, H1_PAD)).astype(jnp.bfloat16)
    b1 = _pad_to(params["b1"], (1, H1_PAD)).astype(jnp.float32)
    w2 = _pad_to(params["w2"], (H1_PAD, H2_PAD)).astype(jnp.bfloat16)
    b2 = _pad_to(params["b2"], (1, H2_PAD)).astype(jnp.float32)
    w3 = _pad_to(params["w3"], (H2_PAD, OUT_PAD)).astype(jnp.bfloat16)
    b3 = _pad_to(params["b3"], (1, OUT_PAD)).astype(jnp.float32)

    grid = (B_pad // TB,)

    flops = 2 * B_pad * (IN_DIM * H1_PAD + H1_PAD * H2_PAD + H2_PAD * OUT_PAD)
    bytes_accessed = (x_p.size * 2 + w1.size * 2 + w2.size * 2 + w3.size * 2
                      + (b1.size + b2.size + b3.size) * 4
                      + B_pad * OUT_PAD * 4)

    # VMEM budget: 2x x-tile (double buffer) + resident weights + 2x out tile,
    # plus generous headroom for intermediates.  Fits all chips (v7x: 64 MiB).
    vmem_bytes = min(
        4 * (TB * IN_DIM * 2) + 4 * (TB * OUT_PAD * 4)
        + 2 * (w1.size + w2.size + w3.size) * 2
        + 4 * TB * H1_PAD * 4 + (1 << 20),
        48 << 20)

    out_padded = pl.pallas_call(
        _mlp_kernel,
        out_shape=jax.ShapeDtypeStruct((B_pad, OUT_PAD), jnp.float32),
        grid=grid,
        in_specs=[
            pl.BlockSpec((TB, IN_DIM), lambda i: (i, 0)),       # x: streamed
            pl.BlockSpec((IN_DIM, H1_PAD), lambda i: (0, 0)),   # weights/biases:
            pl.BlockSpec((1, H1_PAD), lambda i: (0, 0)),        # VMEM-resident
            pl.BlockSpec((H1_PAD, H2_PAD), lambda i: (0, 0)),
            pl.BlockSpec((1, H2_PAD), lambda i: (0, 0)),
            pl.BlockSpec((H2_PAD, OUT_PAD), lambda i: (0, 0)),
            pl.BlockSpec((1, OUT_PAD), lambda i: (0, 0)),
        ],
        out_specs=pl.BlockSpec((TB, OUT_PAD), lambda i: (i, 0)),
        compiler_params=pltpu.CompilerParams(
            dimension_semantics=("parallel",),
            vmem_limit_bytes=int(vmem_bytes)),
        cost_estimate=pl.CostEstimate(
            flops=flops, transcendentals=0, bytes_accessed=bytes_accessed),
    )(x_p, w1, b1, w2, b2, w3, b3)

    return out_padded[:B, :OUT]


def init_params(key):
    """Deterministic synthetic init (PyTorch-style fan_in scaling)."""
    ks = jax.random.split(key, 6)

    def linear(kw, kb, fan_in, fan_out):
        bound = 1.0 / jnp.sqrt(fan_in)
        w = jax.random.uniform(kw, (fan_in, fan_out), jnp.float32, -bound, bound)
        b = jax.random.uniform(kb, (1, fan_out), jnp.float32, -bound, bound)
        return w, b

    w1, b1 = linear(ks[0], ks[1], IN_DIM, H1)
    w2, b2 = linear(ks[2], ks[3], H1, H2)
    w3, b3 = linear(ks[4], ks[5], H2, OUT)
    return {"w1": w1, "b1": b1, "w2": w2, "b2": b2, "w3": w3, "b3": b3}


def reference_forward(x, p):
    """Reference with the same bf16-input / f32-accumulate numerics."""
    xb = x.astype(jnp.bfloat16)
    w1 = p["w1"].astype(jnp.bfloat16)
    w2 = p["w2"].astype(jnp.bfloat16)
    w3 = p["w3"].astype(jnp.bfloat16)
    h1 = jnp.maximum(
        jnp.dot(xb, w1, preferred_element_type=jnp.float32) + p["b1"], 0.0)
    h2 = jnp.maximum(
        jnp.dot(h1.astype(jnp.bfloat16), w2,
                preferred_element_type=jnp.float32) + p["b2"], 0.0)
    return jnp.dot(h2.astype(jnp.bfloat16), w3,
                   preferred_element_type=jnp.float32) + p["b3"]


if __name__ == "__main__":
    key = jax.random.PRNGKey(0)
    k_params, k_x = jax.random.split(key)

    params = init_params(k_params)
    x = jax.random.normal(k_x, (2, IN_DIM), jnp.float32)   # batch=2 flattened images

    out = jax.block_until_ready(net_forward(x, params))
    ref = reference_forward(x, params)

    assert out.shape == (2, OUT), out.shape
    assert jnp.allclose(out, ref, atol=1e-2, rtol=1e-2), "mismatch vs reference"
    print("KERNEL_OK")
</pallas_src>

<mosaic_0001>
module attributes {stable_mosaic.version = 11 : i64} {
  func.func @_mlp_kernel(%arg0: i32, %arg1: memref<8x3072xbf16, #tpu.memory_space<vmem>>, %arg2: memref<3072x128xbf16, #tpu.memory_space<vmem>>, %arg3: memref<1x128xf32, #tpu.memory_space<vmem>>, %arg4: memref<128x128xbf16, #tpu.memory_space<vmem>>, %arg5: memref<1x128xf32, #tpu.memory_space<vmem>>, %arg6: memref<128x128xbf16, #tpu.memory_space<vmem>>, %arg7: memref<1x128xf32, #tpu.memory_space<vmem>>, %arg8: memref<8x128xf32, #tpu.memory_space<vmem>>) attributes {dimension_semantics = [#tpu.dimension_semantics<parallel>], iteration_bounds = array<i64: 1>, scalar_prefetch = 0 : i64, scratch_operands = 0 : i64, tpu.core_type = #tpu.core_type<tc>, window_params = [{transform_indices = @transform_0, window_bounds = array<i64: 8, 3072>}, {pipeline_mode = #tpu.pipeline_mode<synchronous>, transform_indices = @transform_1, window_bounds = array<i64: 3072, 128>}, {pipeline_mode = #tpu.pipeline_mode<synchronous>, transform_indices = @transform_2, window_bounds = array<i64: 1, 128>}, {pipeline_mode = #tpu.pipeline_mode<synchronous>, transform_indices = @transform_3, window_bounds = array<i64: 128, 128>}, {pipeline_mode = #tpu.pipeline_mode<synchronous>, transform_indices = @transform_4, window_bounds = array<i64: 1, 128>}, {pipeline_mode = #tpu.pipeline_mode<synchronous>, transform_indices = @transform_5, window_bounds = array<i64: 128, 128>}, {pipeline_mode = #tpu.pipeline_mode<synchronous>, transform_indices = @transform_6, window_bounds = array<i64: 1, 128>}, {transform_indices = @transform_7, window_bounds = array<i64: 8, 128>}]} {
    %c0 = arith.constant 0 : index
    %c0_0 = arith.constant 0 : index
    %0 = vector.load %arg1[%c0, %c0_0] : memref<8x3072xbf16, #tpu.memory_space<vmem>>, vector<8x3072xbf16>
    %c0_1 = arith.constant 0 : index
    %c0_2 = arith.constant 0 : index
    %1 = vector.load %arg2[%c0_1, %c0_2] : memref<3072x128xbf16, #tpu.memory_space<vmem>>, vector<3072x128xbf16>
    %cst = arith.constant dense<0.000000e+00> : vector<8x128xf32>
    %2 = tpu.matmul %0, %1, %cst {dimension_numbers = #tpu.dot_dimension_numbers<[1], [0], [0], [1], [0, 0, 1, 1], [], []>} : vector<8x3072xbf16>, vector<3072x128xbf16>, vector<8x128xf32> -> vector<8x128xf32>
    %c0_3 = arith.constant 0 : index
    %c0_4 = arith.constant 0 : index
    %3 = vector.load %arg3[%c0_3, %c0_4] : memref<1x128xf32, #tpu.memory_space<vmem>>, vector<1x128xf32>
    %4 = vector.broadcast %3 : vector<1x128xf32> to vector<8x128xf32>
    %5 = arith.addf %2, %4 : vector<8x128xf32>
    %cst_5 = arith.constant 0.000000e+00 : f32
    %6 = vector.broadcast %cst_5 : f32 to vector<8x128xf32>
    %7 = arith.maximumf %5, %6 : vector<8x128xf32>
    %8 = arith.truncf %7 : vector<8x128xf32> to vector<8x128xbf16>
    %c0_6 = arith.constant 0 : index
    %c0_7 = arith.constant 0 : index
    %9 = vector.load %arg4[%c0_6, %c0_7] : memref<128x128xbf16, #tpu.memory_space<vmem>>, vector<128x128xbf16>
    %cst_8 = arith.constant dense<0.000000e+00> : vector<8x128xf32>
    %10 = tpu.matmul %8, %9, %cst_8 {dimension_numbers = #tpu.dot_dimension_numbers<[1], [0], [0], [1], [0, 0, 1, 1], [], []>} : vector<8x128xbf16>, vector<128x128xbf16>, vector<8x128xf32> -> vector<8x128xf32>
    %c0_9 = arith.constant 0 : index
    %c0_10 = arith.constant 0 : index
    %11 = vector.load %arg5[%c0_9, %c0_10] : memref<1x128xf32, #tpu.memory_space<vmem>>, vector<1x128xf32>
    %12 = vector.broadcast %11 : vector<1x128xf32> to vector<8x128xf32>
    %13 = arith.addf %10, %12 : vector<8x128xf32>
    %cst_11 = arith.constant 0.000000e+00 : f32
    %14 = vector.broadcast %cst_11 : f32 to vector<8x128xf32>
    %15 = arith.maximumf %13, %14 : vector<8x128xf32>
    %16 = arith.truncf %15 : vector<8x128xf32> to vector<8x128xbf16>
    %c0_12 = arith.constant 0 : index
    %c0_13 = arith.constant 0 : index
    %17 = vector.load %arg6[%c0_12, %c0_13] : memref<128x128xbf16, #tpu.memory_space<vmem>>, vector<128x128xbf16>
    %cst_14 = arith.constant dense<0.000000e+00> : vector<8x128xf32>
    %18 = tpu.matmul %16, %17, %cst_14 {dimension_numbers = #tpu.dot_dimension_numbers<[1], [0], [0], [1], [0, 0, 1, 1], [], []>} : vector<8x128xbf16>, vector<128x128xbf16>, vector<8x128xf32> -> vector<8x128xf32>
    %c0_15 = arith.constant 0 : index
    %c0_16 = arith.constant 0 : index
    %19 = vector.load %arg7[%c0_15, %c0_16] : memref<1x128xf32, #tpu.memory_space<vmem>>, vector<1x128xf32>
    %20 = vector.broadcast %19 : vector<1x128xf32> to vector<8x128xf32>
    %21 = arith.addf %18, %20 : vector<8x128xf32>
    %c0_17 = arith.constant 0 : index
    %c0_18 = arith.constant 0 : index
    %22 = vector.load %arg8[%c0_17, %c0_18] : memref<8x128xf32, #tpu.memory_space<vmem>>, vector<8x128xf32>
    tpu.vector_store %arg8[%c0_17, %c0_18], %21 {strides = array<i32>} : memref<8x128xf32, #tpu.memory_space<vmem>>, vector<8x128xf32>,
    return
  }
  func.func @transform_0(%arg0: i32) -> (i32, i32) {
    %c0_i32 = arith.constant 0 : i32
    %c0_i32_0 = arith.constant 0 : i32
    return %arg0, %c0_i32 : i32, i32
  }
  func.func @transform_1(%arg0: i32) -> (i32, i32) {
    %c0_i32 = arith.constant 0 : i32
    %c0_i32_0 = arith.constant 0 : i32
    %c0_i32_1 = arith.constant 0 : i32
    return %c0_i32, %c0_i32_0 : i32, i32
  }
  func.func @transform_2(%arg0: i32) -> (i32, i32) {
    %c0_i32 = arith.constant 0 : i32
    %c0_i32_0 = arith.constant 0 : i32
    %c0_i32_1 = arith.constant 0 : i32
    return %c0_i32, %c0_i32_0 : i32, i32
  }
  func.func @transform_3(%arg0: i32) -> (i32, i32) {
    %c0_i32 = arith.constant 0 : i32
    %c0_i32_0 = arith.constant 0 : i32
    %c0_i32_1 = arith.constant 0 : i32
    return %c0_i32, %c0_i32_0 : i32, i32
  }
  func.func @transform_4(%arg0: i32) -> (i32, i32) {
    %c0_i32 = arith.constant 0 : i32
    %c0_i32_0 = arith.constant 0 : i32
    %c0_i32_1 = arith.constant 0 : i32
    return %c0_i32, %c0_i32_0 : i32, i32
  }
  func.func @transform_5(%arg0: i32) -> (i32, i32) {
    %c0_i32 = arith.constant 0 : i32
    %c0_i32_0 = arith.constant 0 : i32
    %c0_i32_1 = arith.constant 0 : i32
    return %c0_i32, %c0_i32_0 : i32, i32
  }
  func.func @transform_6(%arg0: i32) -> (i32, i32) {
    %c0_i32 = arith.constant 0 : i32
    %c0_i32_0 = arith.constant 0 : i32
    %c0_i32_1 = arith.constant 0 : i32
    return %c0_i32, %c0_i32_0 : i32, i32
  }
  func.func @transform_7(%arg0: i32) -> (i32, i32) {
    %c0_i32 = arith.constant 0 : i32
    %c0_i32_0 = arith.constant 0 : i32
    return %arg0, %c0_i32 : i32, i32
  }
}

</mosaic_0001>

<bundles_post_ra>
// kernel: net_forward.1
= control target key start
LH: loop header
LB: loop body
LE: loop exit
PB: predicated region body
PF: predicated region fallthrough
CT: control target
= control target key end

     0   :  { %s3900_s1 = inlined_call_operand.vmem [shape: bf16[3072,128], index: 1, kind: input, shape index: {}]   ;;  %s3901_s0 = inlined_call_operand.vmem [shape: bf16[8,3072], index: 0, kind: input, shape index: {}]   ;;  %s3902_s2 = inlined_call_operand.vmem [shape: f32[1,128], index: 2, kind: input, shape index: {}]   ;;  %s3903_s4 = inlined_call_operand.vmem [shape: f32[1,128], index: 4, kind: input, shape index: {}]   ;;  %s3904_s3 = inlined_call_operand.vmem [shape: bf16[128,128], index: 3, kind: input, shape index: {}]   ;;  %s3905_s5 = inlined_call_operand.vmem [shape: bf16[128,128], index: 5, kind: input, shape index: {}]   ;;  %s3906_s6 = inlined_call_operand.vmem [shape: f32[1,128], index: 6, kind: input, shape index: {}]   ;;  %s3907_s7 = inlined_call_operand.vmem [shape: f32[8,128], index: 7, kind: output, shape index: {}]  }
   0x1   :  { %v2984_v0 = vld [vmem:[%s3900_s1 + $0x38] sm:$0xff]  ;;  %v2983_v4 = vld [vmem:[%s3900_s1 + $0x30] sm:$0xff]  ;;  %v2982_v8 = vld [vmem:[%s3900_s1 + $0x28] sm:$0xff] }
   0x2   :  { %v2992_v1 = vld [vmem:[%s3900_s1 + $0x78] sm:$0xff]  ;;  %1662 = vmatpush.bf16.msra.mxu0 %v2984_v0  ;;  %v2991_v5 = vld [vmem:[%s3900_s1 + $0x70] sm:$0xff]  ;;  %v2990_v9 = vld [vmem:[%s3900_s1 + $0x68] sm:$0xff] }
   0x3   :  { %v3000_v2 = vld [vmem:[%s3900_s1 + $0xb8] sm:$0xff]  ;;  %1675 = vmatpush.bf16.msra.mxu1 %v2992_v1  ;;  %v2999_v6 = vld [vmem:[%s3900_s1 + $0xb0] sm:$0xff]  ;;  %v2998_v10 = vld [vmem:[%s3900_s1 + $0xa8] sm:$0xff] }
   0x4   :  { %v3008_v3 = vld [vmem:[%s3900_s1 + $0xf8] sm:$0xff]  ;;  %1688 = vmatpush.bf16.msra.mxu2 %v3000_v2  ;;  %v3007_v7 = vld [vmem:[%s3900_s1 + $0xf0] sm:$0xff]  ;;  %v3006_v11 = vld [vmem:[%s3900_s1 + $0xe8] sm:$0xff] }
   0x5   :  { %1701 = vmatpush.bf16.msra.mxu3 %v3008_v3  ;;  %v2981_v12 = vld [vmem:[%s3900_s1 + $0x20] sm:$0xff]  ;;  %v2980_v16 = vld [vmem:[%s3900_s1 + $0x18] sm:$0xff]  ;;  %v2979_v20 = vld [vmem:[%s3900_s1 + $0x10] sm:$0xff] }
   0x6   :  { %1663 = vmatpush.bf16.msra.mxu0 %v2983_v4  ;;  %v2989_v13 = vld [vmem:[%s3900_s1 + $0x60] sm:$0xff]  ;;  %v2988_v17 = vld [vmem:[%s3900_s1 + $0x58] sm:$0xff]  ;;  %v2987_v21 = vld [vmem:[%s3900_s1 + $0x50] sm:$0xff] }
   0x7   :  { %1676 = vmatpush.bf16.msra.mxu1 %v2991_v5  ;;  %v2997_v14 = vld [vmem:[%s3900_s1 + $0xa0] sm:$0xff]  ;;  %v2996_v18 = vld [vmem:[%s3900_s1 + $0x98] sm:$0xff]  ;;  %v2995_v22 = vld [vmem:[%s3900_s1 + $0x90] sm:$0xff] }
   0x8   :  { %1689 = vmatpush.bf16.msra.mxu2 %v2999_v6  ;;  %v3005_v15 = vld [vmem:[%s3900_s1 + $0xe0] sm:$0xff]  ;;  %v3004_v19 = vld [vmem:[%s3900_s1 + $0xd8] sm:$0xff]  ;;  %v3003_v23 = vld [vmem:[%s3900_s1 + $0xd0] sm:$0xff] }
   0x9   :  { %1702 = vmatpush.bf16.msra.mxu3 %v3007_v7  ;;  %v2978_v24 = vld [vmem:[%s3900_s1 + $0x8] sm:$0xff]  ;;  %v26_v29 = vld [vmem:[%s3901_s0] sm:$0xff]  ;;  %v3016_v38 = vld [vmem:[%s3900_s1 + $0x138] sm:$0xff] }
   0xa   :  { %1664 = vmatpush.bf16.msra.mxu0 %v2982_v8  ;;  %v2986_v25 = vld [vmem:[%s3900_s1 + $0x48] sm:$0xff]  ;;  %v2977_v30 = vld [vmem:[%s3900_s1] sm:$0xff]  ;;  %v438_v33 = vunpack.c.l.b16 %v26_v29  ;;  %v439_v37 = vunpack.c.h.b16 %v26_v29  ;;  %v3024_v39 = vld [vmem:[%s3900_s1 + $0x178] sm:$0xff] }
   0xb   :  { %1677 = vmatpush.bf16.msra.mxu1 %v2990_v9  ;;  %v2994_v26 = vld [vmem:[%s3900_s1 + $0x88] sm:$0xff]  ;;  %v2985_v31 = vld [vmem:[%s3900_s1 + $0x40] sm:$0xff]  ;;  %v3032_v40 = vld [vmem:[%s3900_s1 + $0x1b8] sm:$0xff] }
   0xc   :  { %1690 = vmatpush.bf16.msra.mxu2 %v2998_v10  ;;  %v3002_v27 = vld [vmem:[%s3900_s1 + $0xc8] sm:$0xff]  ;;  %v2993_v34 = vld [vmem:[%s3900_s1 + $0x80] sm:$0xff]  ;;  %v3040_v41 = vld [vmem:[%s3900_s1 + $0x1f8] sm:$0xff]  ;;  %v462_v43 = vpack.c.b16 %v438_v33, %v438_v33  ;;  %v463_v45 = vpack.c.b16 %v439_v37, %v439_v37 }
   0xd   :  { %1703 = vmatpush.bf16.msra.mxu3 %v3006_v11  ;;  %v27_v28 = vld [vmem:[%s3901_s0 + $0x8] sm:$0xff]  ;;  %v3001_v35 = vld [vmem:[%s3900_s1 + $0xc0] sm:$0xff]  ;;  %v3015_v46 = vld [vmem:[%s3900_s1 + $0x130] sm:$0xff] }
   0xe   :  { %1665 = vmatpush.bf16.msra.mxu0 %v2981_v12  ;;  %v440_v32 = vunpack.c.l.b16 %v27_v28  ;;  %v441_v36 = vunpack.c.h.b16 %v27_v28  ;;  %v3023_v47 = vld [vmem:[%s3900_s1 + $0x170] sm:$0xff]  ;;  %v3014_v50 = vld [vmem:[%s3900_s1 + $0x128] sm:$0xff]  ;;  %v3013_v54 = vld [vmem:[%s3900_s1 + $0x120] sm:$0xff] }
   0xf   :  { %1678 = vmatpush.bf16.msra.mxu1 %v2989_v13  ;;  %v3031_v48 = vld [vmem:[%s3900_s1 + $0x1b0] sm:$0xff]  ;;  %v3022_v51 = vld [vmem:[%s3900_s1 + $0x168] sm:$0xff]  ;;  %v3021_v55 = vld [vmem:[%s3900_s1 + $0x160] sm:$0xff] }
  0x10   :  { %1691 = vmatpush.bf16.msra.mxu2 %v2997_v14  ;;  %v464_v42 = vpack.c.b16 %v440_v32, %v440_v32  ;;  %v465_v44 = vpack.c.b16 %v441_v36, %v441_v36  ;;  %v3039_v49 = vld [vmem:[%s3900_s1 + $0x1f0] sm:$0xff]  ;;  %v3030_v52 = vld [vmem:[%s3900_s1 + $0x1a8] sm:$0xff]  ;;  %v3029_v56 = vld [vmem:[%s3900_s1 + $0x1a0] sm:$0xff] }
  0x11   :  { %1704 = vmatpush.bf16.msra.mxu3 %v3005_v15  ;;  %v3038_v53 = vld [vmem:[%s3900_s1 + $0x1e8] sm:$0xff]  ;;  %v3037_v57 = vld [vmem:[%s3900_s1 + $0x1e0] sm:$0xff]  ;;  %v3012_v58 = vld [vmem:[%s3900_s1 + $0x118] sm:$0xff] }
  0x12   :  { %1666 = vmatpush.bf16.msra.mxu0 %v2980_v16  ;;  %v3020_v59 = vld [vmem:[%s3900_s1 + $0x158] sm:$0xff]  ;;  %v3011_v62 = vld [vmem:[%s3900_s1 + $0x110] sm:$0xff]  ;;  %v3010_v2 = vld [vmem:[%s3900_s1 + $0x108] sm:$0xff] }
  0x13   :  { %1679 = vmatpush.bf16.msra.mxu1 %v2988_v17  ;;  %v3028_v60 = vld [vmem:[%s3900_s1 + $0x198] sm:$0xff]  ;;  %v3019_v63 = vld [vmem:[%s3900_s1 + $0x150] sm:$0xff]  ;;  %v3018_v3 = vld [vmem:[%s3900_s1 + $0x148] sm:$0xff] }
  0x14   :  { %1692 = vmatpush.bf16.msra.mxu2 %v2996_v18  ;;  %v3036_v61 = vld [vmem:[%s3900_s1 + $0x1d8] sm:$0xff]  ;;  %v3027_v0 = vld [vmem:[%s3900_s1 + $0x190] sm:$0xff]  ;;  %v3026_v4 = vld [vmem:[%s3900_s1 + $0x188] sm:$0xff] }
  0x15   :  { %1705 = vmatpush.bf16.msra.mxu3 %v3004_v19  ;;  %v3035_v1 = vld [vmem:[%s3900_s1 + $0x1d0] sm:$0xff]  ;;  %v3034_v5 = vld [vmem:[%s3900_s1 + $0x1c8] sm:$0xff]  ;;  %v29_v6 = vld [vmem:[%s3901_s0 + $0x18] sm:$0xff] }
  0x16   :  { %1667 = vmatpush.bf16.msra.mxu0 %v2979_v20  ;;  %v28_v7 = vld [vmem:[%s3901_s0 + $0x10] sm:$0xff]  ;;  %v3009_v8 = vld [vmem:[%s3900_s1 + $0x100] sm:$0xff]  ;;  %v444_v10 = vunpack.c.l.b16 %v29_v6  ;;  %v445_v14 = vunpack.c.h.b16 %v29_v6  ;;  %v3048_v16 = vld [vmem:[%s3900_s1 + $0x238] sm:$0xff] }
  0x17   :  { %1680 = vmatpush.bf16.msra.mxu1 %v2987_v21  ;;  %v3017_v9 = vld [vmem:[%s3900_s1 + $0x140] sm:$0xff]  ;;  %v442_v11 = vunpack.c.l.b16 %v28_v7  ;;  %v443_v15 = vunpack.c.h.b16 %v28_v7  ;;  %v3056_v17 = vld [vmem:[%s3900_s1 + $0x278] sm:$0xff]  ;;  %v3046_v28 = vld [vmem:[%s3900_s1 + $0x228] sm:$0xff] }
  0x18   :  { %1693 = vmatpush.bf16.msra.mxu2 %v2995_v22  ;;  %v3025_v12 = vld [vmem:[%s3900_s1 + $0x180] sm:$0xff]  ;;  %v3064_v18 = vld [vmem:[%s3900_s1 + $0x2b8] sm:$0xff]  ;;  %v468_v20 = vpack.c.b16 %v444_v10, %v444_v10  ;;  %v469_v22 = vpack.c.b16 %v445_v14, %v445_v14  ;;  %v3054_v29 = vld [vmem:[%s3900_s1 + $0x268] sm:$0xff] }
  0x19   :  { %1706 = vmatpush.bf16.msra.mxu3 %v3003_v23  ;;  %v3033_v13 = vld [vmem:[%s3900_s1 + $0x1c0] sm:$0xff]  ;;  %v3072_v19 = vld [vmem:[%s3900_s1 + $0x2f8] sm:$0xff]  ;;  %v466_v21 = vpack.c.b16 %v442_v11, %v442_v11  ;;  %v467_v23 = vpack.c.b16 %v443_v15, %v443_v15  ;;  %v3078_v6 = vld [vmem:[%s3900_s1 + $0x328] sm:$0xff] }
  0x1a   :  { %1668 = vmatpush.bf16.msra.mxu0 %v2978_v24  ;;  %v3047_v24 = vld [vmem:[%s3900_s1 + $0x230] sm:$0xff]  ;;  %v3045_v32 = vld [vmem:[%s3900_s1 + $0x220] sm:$0xff]  ;;  %v3044_v36 = vld [vmem:[%s3900_s1 + $0x218] sm:$0xff] }
  0x1b   :  { %1681 = vmatpush.bf16.msra.mxu1 %v2986_v25  ;;  %v3055_v25 = vld [vmem:[%s3900_s1 + $0x270] sm:$0xff]  ;;  %v3053_v33 = vld [vmem:[%s3900_s1 + $0x260] sm:$0xff]  ;;  %v3052_v37 = vld [vmem:[%s3900_s1 + $0x258] sm:$0xff] }
  0x1c   :  { %1694 = vmatpush.bf16.msra.mxu2 %v2994_v26  ;;  %v3063_v26 = vld [vmem:[%s3900_s1 + $0x2b0] sm:$0xff]  ;;  %v3086_v7 = vld [vmem:[%s3900_s1 + $0x368] sm:$0xff]  ;;  %v3077_v10 = vld [vmem:[%s3900_s1 + $0x320] sm:$0xff] }
  0x1d   :  { %1707 = vmatpush.bf16.msra.mxu3 %v3002_v27  ;;  %v3071_v27 = vld [vmem:[%s3900_s1 + $0x2f0] sm:$0xff]  ;;  %v3085_v11 = vld [vmem:[%s3900_s1 + $0x360] sm:$0xff]  ;;  %v3076_v14 = vld [vmem:[%s3900_s1 + $0x318] sm:$0xff] }
  0x1e   :  { %1669 = vmatpush.bf16.msra.mxu0 %v2977_v30  ;;  %v3062_v30 = vld [vmem:[%s3900_s1 + $0x2a8] sm:$0xff]  ;;  %v3084_v15 = vld [vmem:[%s3900_s1 + $0x358] sm:$0xff] }
  0x1f   :  { %1682 = vmatpush.bf16.msra.mxu1 %v2985_v31  ;;  %v3070_v31 = vld [vmem:[%s3900_s1 + $0x2e8] sm:$0xff] }
  0x20   :  { %1695 = vmatpush.bf16.msra.mxu2 %v2993_v34  ;;  %v3061_v34 = vld [vmem:[%s3900_s1 + $0x2a0] sm:$0xff] }
  0x21   :  { %1708 = vmatpush.bf16.msra.mxu3 %v3001_v35  ;;  %1670 = vmatmul.bf16.vlgmr.msra.gmra.mxu0 %v462_v43  ;;  %v3069_v35 = vld [vmem:[%s3900_s1 + $0x2e0] sm:$0xff]  ;;  %v3067_v43 = vld [vmem:[%s3900_s1 + $0x2d0] sm:$0xff] }
  0x22   :  { %1714 = vmatpush.bf16.msrb.mxu0 %v3016_v38  ;;  %1683 = vmatmul.bf16.vlgmr.msra.gmra.mxu1 %v463_v45  ;;  %v3060_v38 = vld [vmem:[%s3900_s1 + $0x298] sm:$0xff]  ;;  %v3050_v45 = vld [vmem:[%s3900_s1 + $0x248] sm:$0xff] }
  0x23   :  { %1727 = vmatpush.bf16.msrb.mxu1 %v3024_v39  ;;  %1696 = vmatmul.bf16.vlgmr.msra.gmra.mxu2 %v464_v42  ;;  %v3068_v39 = vld [vmem:[%s3900_s1 + $0x2d8] sm:$0xff]  ;;  %v3059_v42 = vld [vmem:[%s3900_s1 + $0x290] sm:$0xff] }
  0x24   :  { %1740 = vmatpush.bf16.msrb.mxu2 %v3032_v40  ;;  %1709 = vmatmul.bf16.vlgmr.msra.gmra.mxu3 %v465_v44  ;;  %v3043_v40 = vld [vmem:[%s3900_s1 + $0x210] sm:$0xff]  ;;  %v3042_v44 = vld [vmem:[%s3900_s1 + $0x208] sm:$0xff] }
  0x25   :  { %1753 = vmatpush.bf16.msrb.mxu3 %v3040_v41  ;;  %v3051_v41 = vld [vmem:[%s3900_s1 + $0x250] sm:$0xff] }
  0x26   :  { %1715 = vmatpush.bf16.msrb.mxu0 %v3015_v46  ;;  %v3058_v46 = vld [vmem:[%s3900_s1 + $0x288] sm:$0xff] }
  0x27   :  { %1728 = vmatpush.bf16.msrb.mxu1 %v3023_v47  ;;  %v3066_v47 = vld [vmem:[%s3900_s1 + $0x2c8] sm:$0xff] }
  0x28   :  { %1741 = vmatpush.bf16.msrb.mxu2 %v3031_v48  ;;  %v30_v48 = vld [vmem:[%s3901_s0 + $0x20] sm:$0xff] }
  0x29   :  { %1754 = vmatpush.bf16.msrb.mxu3 %v3039_v49  ;;  %v31_v49 = vld [vmem:[%s3901_s0 + $0x28] sm:$0xff] }
  0x2a   :  { %1716 = vmatpush.bf16.msrb.mxu0 %v3014_v50  ;;  %v3041_v50 = vld [vmem:[%s3900_s1 + $0x200] sm:$0xff] }
  0x2b   :  { %1729 = vmatpush.bf16.msrb.mxu1 %v3022_v51  ;;  %v3049_v51 = vld [vmem:[%s3900_s1 + $0x240] sm:$0xff] }
  0x2c   :  { %1742 = vmatpush.bf16.msrb.mxu2 %v3030_v52  ;;  %v446_v52 = vunpack.c.l.b16 %v30_v48 }
  0x2d   :  { %1755 = vmatpush.bf16.msrb.mxu3 %v3038_v53  ;;  %v448_v53 = vunpack.c.l.b16 %v31_v49 }
  0x2e   :  { %1717 = vmatpush.bf16.msrb.mxu0 %v3013_v54  ;;  %v3057_v54 = vld [vmem:[%s3900_s1 + $0x280] sm:$0xff] }
  0x2f   :  { %1730 = vmatpush.bf16.msrb.mxu1 %v3021_v55  ;;  %v3065_v55 = vld [vmem:[%s3900_s1 + $0x2c0] sm:$0xff] }
  0x30   :  { %1743 = vmatpush.bf16.msrb.mxu2 %v3029_v56  ;;  %v447_v56 = vunpack.c.h.b16 %v30_v48  ;;  %v3110_v48 = vld [vmem:[%s3900_s1 + $0x428] sm:$0xff] }
  0x31   :  { %1756 = vmatpush.bf16.msrb.mxu3 %v3037_v57  ;;  %v449_v57 = vunpack.c.h.b16 %v31_v49  ;;  %v3118_v49 = vld [vmem:[%s3900_s1 + $0x468] sm:$0xff] }
  0x32   :  { %1718 = vmatpush.bf16.msrb.mxu0 %v3012_v58  ;;  %v3080_v58 = vld [vmem:[%s3900_s1 + $0x338] sm:$0xff] }
  0x33   :  { %1731 = vmatpush.bf16.msrb.mxu1 %v3020_v59  ;;  %v3088_v59 = vld [vmem:[%s3900_s1 + $0x378] sm:$0xff] }
  0x34   :  { %1744 = vmatpush.bf16.msrb.mxu2 %v3028_v60  ;;  %v3096_v60 = vld [vmem:[%s3900_s1 + $0x3b8] sm:$0xff] }
  0x35   :  { %1757 = vmatpush.bf16.msrb.mxu3 %v3036_v61  ;;  %v3104_v61 = vld [vmem:[%s3900_s1 + $0x3f8] sm:$0xff] }
  0x36   :  { %1719 = vmatpush.bf16.msrb.mxu0 %v3011_v62  ;;  %v470_v62 = vpack.c.b16 %v446_v52, %v446_v52  ;;  %v3109_v52 = vld [vmem:[%s3900_s1 + $0x420] sm:$0xff] }
  0x37   :  { %1732 = vmatpush.bf16.msrb.mxu1 %v3019_v63  ;;  %v472_v63 = vpack.c.b16 %v448_v53, %v448_v53  ;;  %v3117_v53 = vld [vmem:[%s3900_s1 + $0x460] sm:$0xff] }
  0x38   :  { %1745 = vmatpush.bf16.msrb.mxu2 %v3027_v0  ;;  %v471_v0 = vpack.c.b16 %v447_v56, %v447_v56  ;;  %v3108_v56 = vld [vmem:[%s3900_s1 + $0x418] sm:$0xff] }
  0x39   :  { %1758 = vmatpush.bf16.msrb.mxu3 %v3035_v1  ;;  %v473_v1 = vpack.c.b16 %v449_v57, %v449_v57  ;;  %v3116_v57 = vld [vmem:[%s3900_s1 + $0x458] sm:$0xff] }
  0x3a   :  { %1720 = vmatpush.bf16.msrb.mxu0 %v3010_v2  ;;  %v3079_v2 = vld [vmem:[%s3900_s1 + $0x330] sm:$0xff] }
  0x3b   :  { %1733 = vmatpush.bf16.msrb.mxu1 %v3018_v3  ;;  %v3087_v3 = vld [vmem:[%s3900_s1 + $0x370] sm:$0xff] }
  0x3c   :  { %1746 = vmatpush.bf16.msrb.mxu2 %v3026_v4  ;;  %v3095_v4 = vld [vmem:[%s3900_s1 + $0x3b0] sm:$0xff] }
  0x3d   :  { %1759 = vmatpush.bf16.msrb.mxu3 %v3034_v5  ;;  %v3103_v5 = vld [vmem:[%s3900_s1 + $0x3f0] sm:$0xff] }
  0x3e   :  { %1721 = vmatpush.bf16.msrb.mxu0 %v3009_v8  ;;  %v3094_v8 = vld [vmem:[%s3900_s1 + $0x3a8] sm:$0xff] }
  0x3f   :  { %1734 = vmatpush.bf16.msrb.mxu1 %v3017_v9  ;;  %v3102_v9 = vld [vmem:[%s3900_s1 + $0x3e8] sm:$0xff] }
  0x40   :  { %1747 = vmatpush.bf16.msrb.mxu2 %v3025_v12  ;;  %v3093_v12 = vld [vmem:[%s3900_s1 + $0x3a0] sm:$0xff] }
  0x41   :  { %1760 = vmatpush.bf16.msrb.mxu3 %v3033_v13  ;;  %1722 = vmatmul.bf16.vlgmr.msrb.gmra.mxu0 %v466_v21  ;;  %v3101_v13 = vld [vmem:[%s3900_s1 + $0x3e0] sm:$0xff]  ;;  %v3099_v21 = vld [vmem:[%s3900_s1 + $0x3d0] sm:$0xff] }
  0x42   :  { %1766 = vmatpush.bf16.msra.mxu0 %v3048_v16  ;;  %1735 = vmatmul.bf16.vlgmr.msrb.gmra.mxu1 %v467_v23  ;;  %v3092_v16 = vld [vmem:[%s3900_s1 + $0x398] sm:$0xff]  ;;  %v3082_v23 = vld [vmem:[%s3900_s1 + $0x348] sm:$0xff] }
  0x43   :  { %1779 = vmatpush.bf16.msra.mxu1 %v3056_v17  ;;  %1748 = vmatmul.bf16.vlgmr.msrb.gmra.mxu2 %v468_v20  ;;  %v3100_v17 = vld [vmem:[%s3900_s1 + $0x3d8] sm:$0xff]  ;;  %v3091_v20 = vld [vmem:[%s3900_s1 + $0x390] sm:$0xff] }
  0x44   :  { %1792 = vmatpush.bf16.msra.mxu2 %v3064_v18  ;;  %1761 = vmatmul.bf16.vlgmr.msrb.gmra.mxu3 %v469_v22  ;;  %v3075_v18 = vld [vmem:[%s3900_s1 + $0x310] sm:$0xff]  ;;  %v3074_v22 = vld [vmem:[%s3900_s1 + $0x308] sm:$0xff] }
  0x45   :  { %1805 = vmatpush.bf16.msra.mxu3 %v3072_v19  ;;  %v3083_v19 = vld [vmem:[%s3900_s1 + $0x350] sm:$0xff] }
  0x46   :  { %1767 = vmatpush.bf16.msra.mxu0 %v3047_v24  ;;  %v3090_v24 = vld [vmem:[%s3900_s1 + $0x388] sm:$0xff] }
  0x47   :  { %1780 = vmatpush.bf16.msra.mxu1 %v3055_v25  ;;  %v3098_v25 = vld [vmem:[%s3900_s1 + $0x3c8] sm:$0xff] }
  0x48   :  { %1793 = vmatpush.bf16.msra.mxu2 %v3063_v26  ;;  %v32_v26 = vld [vmem:[%s3901_s0 + $0x30] sm:$0xff] }
  0x49   :  { %1806 = vmatpush.bf16.msra.mxu3 %v3071_v27  ;;  %v33_v27 = vld [vmem:[%s3901_s0 + $0x38] sm:$0xff] }
  0x4a   :  { %1768 = vmatpush.bf16.msra.mxu0 %v3046_v28  ;;  %v3073_v28 = vld [vmem:[%s3900_s1 + $0x300] sm:$0xff] }
  0x4b   :  { %1781 = vmatpush.bf16.msra.mxu1 %v3054_v29  ;;  %v3081_v29 = vld [vmem:[%s3900_s1 + $0x340] sm:$0xff] }
  0x4c   :  { %1794 = vmatpush.bf16.msra.mxu2 %v3062_v30  ;;  %v450_v30 = vunpack.c.l.b16 %v32_v26 }
  0x4d   :  { %1807 = vmatpush.bf16.msra.mxu3 %v3070_v31  ;;  %v452_v31 = vunpack.c.l.b16 %v33_v27 }
  0x4e   :  { %1769 = vmatpush.bf16.msra.mxu0 %v3045_v32  ;;  %v3089_v32 = vld [vmem:[%s3900_s1 + $0x380] sm:$0xff] }
  0x4f   :  { %1782 = vmatpush.bf16.msra.mxu1 %v3053_v33  ;;  %v3097_v33 = vld [vmem:[%s3900_s1 + $0x3c0] sm:$0xff] }
  0x50   :  { %1795 = vmatpush.bf16.msra.mxu2 %v3061_v34  ;;  %v451_v34 = vunpack.c.h.b16 %v32_v26  ;;  %v3142_v26 = vld [vmem:[%s3900_s1 + $0x528] sm:$0xff] }
  0x51   :  { %1808 = vmatpush.bf16.msra.mxu3 %v3069_v35  ;;  %v453_v35 = vunpack.c.h.b16 %v33_v27  ;;  %v3150_v27 = vld [vmem:[%s3900_s1 + $0x568] sm:$0xff] }
  0x52   :  { %1770 = vmatpush.bf16.msra.mxu0 %v3044_v36  ;;  %v3112_v36 = vld [vmem:[%s3900_s1 + $0x438] sm:$0xff] }
  0x53   :  { %1783 = vmatpush.bf16.msra.mxu1 %v3052_v37  ;;  %v3120_v37 = vld [vmem:[%s3900_s1 + $0x478] sm:$0xff] }
  0x54   :  { %1796 = vmatpush.bf16.msra.mxu2 %v3060_v38  ;;  %v3128_v38 = vld [vmem:[%s3900_s1 + $0x4b8] sm:$0xff] }
  0x55   :  { %1809 = vmatpush.bf16.msra.mxu3 %v3068_v39  ;;  %v3136_v39 = vld [vmem:[%s3900_s1 + $0x4f8] sm:$0xff] }
  0x56   :  { %1771 = vmatpush.bf16.msra.mxu0 %v3043_v40  ;;  %v474_v40 = vpack.c.b16 %v450_v30, %v450_v30  ;;  %v3166_v30 = vld [vmem:[%s3900_s1 + $0x5e8] sm:$0xff] }
  0x57   :  { %1784 = vmatpush.bf16.msra.mxu1 %v3051_v41  ;;  %v476_v41 = vpack.c.b16 %v452_v31, %v452_v31 }
  0x58   :  { %1797 = vmatpush.bf16.msra.mxu2 %v3059_v42  ;;  %v475_v42 = vpack.c.b16 %v451_v34, %v451_v34 }
  0x59   :  { %1810 = vmatpush.bf16.msra.mxu3 %v3067_v43  ;;  %v477_v43 = vpack.c.b16 %v453_v35, %v453_v35 }
  0x5a   :  { %1772 = vmatpush.bf16.msra.mxu0 %v3042_v44  ;;  %v3111_v44 = vld [vmem:[%s3900_s1 + $0x430] sm:$0xff] }
  0x5b   :  { %1785 = vmatpush.bf16.msra.mxu1 %v3050_v45  ;;  %v3119_v45 = vld [vmem:[%s3900_s1 + $0x470] sm:$0xff] }
  0x5c   :  { %1798 = vmatpush.bf16.msra.mxu2 %v3058_v46  ;;  %v3127_v46 = vld [vmem:[%s3900_s1 + $0x4b0] sm:$0xff] }
  0x5d   :  { %1811 = vmatpush.bf16.msra.mxu3 %v3066_v47  ;;  %v3135_v47 = vld [vmem:[%s3900_s1 + $0x4f0] sm:$0xff] }
  0x5e   :  { %1773 = vmatpush.bf16.msra.mxu0 %v3041_v50  ;;  %v3126_v50 = vld [vmem:[%s3900_s1 + $0x4a8] sm:$0xff] }
  0x5f   :  { %1786 = vmatpush.bf16.msra.mxu1 %v3049_v51  ;;  %v3134_v51 = vld [vmem:[%s3900_s1 + $0x4e8] sm:$0xff] }
  0x60   :  { %1799 = vmatpush.bf16.msra.mxu2 %v3057_v54  ;;  %v3125_v54 = vld [vmem:[%s3900_s1 + $0x4a0] sm:$0xff] }
  0x61   :  { %1812 = vmatpush.bf16.msra.mxu3 %v3065_v55  ;;  %1774 = vmatmul.bf16.vlgmr.msra.gmra.mxu0 %v470_v62  ;;  %v3133_v55 = vld [vmem:[%s3900_s1 + $0x4e0] sm:$0xff]  ;;  %v3123_v62 = vld [vmem:[%s3900_s1 + $0x490] sm:$0xff] }
  0x62   :  { %1818 = vmatpush.bf16.msrb.mxu0 %v3080_v58  ;;  %1787 = vmatmul.bf16.vlgmr.msra.gmra.mxu1 %v471_v0  ;;  %v3124_v58 = vld [vmem:[%s3900_s1 + $0x498] sm:$0xff]  ;;  %v3106_v0 = vld [vmem:[%s3900_s1 + $0x408] sm:$0xff] }
  0x63   :  { %1831 = vmatpush.bf16.msrb.mxu1 %v3088_v59  ;;  %1800 = vmatmul.bf16.vlgmr.msra.gmra.mxu2 %v472_v63  ;;  %v3132_v59 = vld [vmem:[%s3900_s1 + $0x4d8] sm:$0xff]  ;;  %v3131_v63 = vld [vmem:[%s3900_s1 + $0x4d0] sm:$0xff] }
  0x64   :  { %1844 = vmatpush.bf16.msrb.mxu2 %v3096_v60  ;;  %1813 = vmatmul.bf16.vlgmr.msra.gmra.mxu3 %v473_v1  ;;  %v3107_v60 = vld [vmem:[%s3900_s1 + $0x410] sm:$0xff]  ;;  %v3114_v1 = vld [vmem:[%s3900_s1 + $0x448] sm:$0xff] }
  0x65   :  { %1857 = vmatpush.bf16.msrb.mxu3 %v3104_v61  ;;  %v3115_v61 = vld [vmem:[%s3900_s1 + $0x450] sm:$0xff] }
  0x66   :  { %1819 = vmatpush.bf16.msrb.mxu0 %v3079_v2  ;;  %v3122_v2 = vld [vmem:[%s3900_s1 + $0x488] sm:$0xff] }
  0x67   :  { %1832 = vmatpush.bf16.msrb.mxu1 %v3087_v3  ;;  %v3130_v3 = vld [vmem:[%s3900_s1 + $0x4c8] sm:$0xff] }
  0x68   :  { %1845 = vmatpush.bf16.msrb.mxu2 %v3095_v4  ;;  %v34_v4 = vld [vmem:[%s3901_s0 + $0x40] sm:$0xff] }
  0x69   :  { %1858 = vmatpush.bf16.msrb.mxu3 %v3103_v5  ;;  %v35_v5 = vld [vmem:[%s3901_s0 + $0x48] sm:$0xff] }
  0x6a   :  { %1820 = vmatpush.bf16.msrb.mxu0 %v3078_v6  ;;  %v3105_v6 = vld [vmem:[%s3900_s1 + $0x400] sm:$0xff] }
  0x6b   :  { %1833 = vmatpush.bf16.msrb.mxu1 %v3086_v7  ;;  %v3113_v7 = vld [vmem:[%s3900_s1 + $0x440] sm:$0xff] }
  0x6c   :  { %1846 = vmatpush.bf16.msrb.mxu2 %v3094_v8  ;;  %v454_v8 = vunpack.c.l.b16 %v34_v4 }
  0x6d   :  { %1859 = vmatpush.bf16.msrb.mxu3 %v3102_v9  ;;  %v456_v9 = vunpack.c.l.b16 %v35_v5 }
  0x6e   :  { %1821 = vmatpush.bf16.msrb.mxu0 %v3077_v10  ;;  %v3121_v10 = vld [vmem:[%s3900_s1 + $0x480] sm:$0xff] }
  0x6f   :  { %1834 = vmatpush.bf16.msrb.mxu1 %v3085_v11  ;;  %v3129_v11 = vld [vmem:[%s3900_s1 + $0x4c0] sm:$0xff] }
  0x70   :  { %1847 = vmatpush.bf16.msrb.mxu2 %v3093_v12  ;;  %v455_v12 = vunpack.c.h.b16 %v34_v4  ;;  %v3161_v4 = vld [vmem:[%s3900_s1 + $0x5c0] sm:$0xff] }
  0x71   :  { %1860 = vmatpush.bf16.msrb.mxu3 %v3101_v13  ;;  %v457_v13 = vunpack.c.h.b16 %v35_v5 }
  0x72   :  { %1822 = vmatpush.bf16.msrb.mxu0 %v3076_v14  ;;  %v3144_v14 = vld [vmem:[%s3900_s1 + $0x538] sm:$0xff] }
  0x73   :  { %1835 = vmatpush.bf16.msrb.mxu1 %v3084_v15  ;;  %v3152_v15 = vld [vmem:[%s3900_s1 + $0x578] sm:$0xff] }
  0x74   :  { %1848 = vmatpush.bf16.msrb.mxu2 %v3092_v16  ;;  %v3160_v16 = vld [vmem:[%s3900_s1 + $0x5b8] sm:$0xff] }
  0x75   :  { %1861 = vmatpush.bf16.msrb.mxu3 %v3100_v17  ;;  %v3168_v17 = vld [vmem:[%s3900_s1 + $0x5f8] sm:$0xff] }
  0x76   :  { %1823 = vmatpush.bf16.msrb.mxu0 %v3075_v18  ;;  %v478_v18 = vpack.c.b16 %v454_v8, %v454_v8 }
  0x77   :  { %1836 = vmatpush.bf16.msrb.mxu1 %v3083_v19  ;;  %v480_v19 = vpack.c.b16 %v456_v9, %v456_v9 }
  0x78   :  { %1849 = vmatpush.bf16.msrb.mxu2 %v3091_v20  ;;  %v479_v20 = vpack.c.b16 %v455_v12, %v455_v12 }
  0x79   :  { %1862 = vmatpush.bf16.msrb.mxu3 %v3099_v21  ;;  %v481_v21 = vpack.c.b16 %v457_v13, %v457_v13 }
  0x7a   :  { %1824 = vmatpush.bf16.msrb.mxu0 %v3074_v22  ;;  %v3143_v22 = vld [vmem:[%s3900_s1 + $0x530] sm:$0xff] }
  0x7b   :  { %1837 = vmatpush.bf16.msrb.mxu1 %v3082_v23  ;;  %v3151_v23 = vld [vmem:[%s3900_s1 + $0x570] sm:$0xff] }
  0x7c   :  { %1850 = vmatpush.bf16.msrb.mxu2 %v3090_v24  ;;  %v3159_v24 = vld [vmem:[%s3900_s1 + $0x5b0] sm:$0xff] }
  0x7d   :  { %1863 = vmatpush.bf16.msrb.mxu3 %v3098_v25  ;;  %v3167_v25 = vld [vmem:[%s3900_s1 + $0x5f0] sm:$0xff] }
  0x7e   :  { %1825 = vmatpush.bf16.msrb.mxu0 %v3073_v28  ;;  %v3185_v28 = vld [vmem:[%s3902_s2] ss:$0 sm:$0xff] }
  0x7f   :  { %1838 = vmatpush.bf16.msrb.mxu1 %v3081_v29  ;;  %v3158_v29 = vld [vmem:[%s3900_s1 + $0x5a8] sm:$0xff] }
  0x80   :  { %1851 = vmatpush.bf16.msrb.mxu2 %v3089_v32  ;;  %v3141_v32 = vld [vmem:[%s3900_s1 + $0x520] sm:$0xff] }
  0x81   :  { %1864 = vmatpush.bf16.msrb.mxu3 %v3097_v33  ;;  %1826 = vmatmul.bf16.vlgmr.msrb.gmra.mxu0 %v474_v40  ;;  %v3149_v33 = vld [vmem:[%s3900_s1 + $0x560] sm:$0xff]  ;;  %v3148_v40 = vld [vmem:[%s3900_s1 + $0x558] sm:$0xff] }
  0x82   :  { %1870 = vmatpush.bf16.msra.mxu0 %v3112_v36  ;;  %1839 = vmatmul.bf16.vlgmr.msrb.gmra.mxu1 %v475_v42  ;;  %v3157_v36 = vld [vmem:[%s3900_s1 + $0x5a0] sm:$0xff]  ;;  %v3164_v42 = vld [vmem:[%s3900_s1 + $0x5d8] sm:$0xff] }
  0x83   :  { %1883 = vmatpush.bf16.msra.mxu1 %v3120_v37  ;;  %1852 = vmatmul.bf16.vlgmr.msrb.gmra.mxu2 %v476_v41  ;;  %v3165_v37 = vld [vmem:[%s3900_s1 + $0x5e0] sm:$0xff]  ;;  %v3156_v41 = vld [vmem:[%s3900_s1 + $0x598] sm:$0xff] }
  0x84   :  { %1896 = vmatpush.bf16.msra.mxu2 %v3128_v38  ;;  %1865 = vmatmul.bf16.vlgmr.msrb.gmra.mxu3 %v477_v43 }
  0x85   :  { %1909 = vmatpush.bf16.msra.mxu3 %v3136_v39  ;;  %v3140_v39 = vld [vmem:[%s3900_s1 + $0x518] sm:$0xff] }
  0x86   :  { %1871 = vmatpush.bf16.msra.mxu0 %v3111_v44 }
  0x87   :  { %1884 = vmatpush.bf16.msra.mxu1 %v3119_v45 }
  0x88   :  { %1897 = vmatpush.bf16.msra.mxu2 %v3127_v46 }
  0x89   :  { %1910 = vmatpush.bf16.msra.mxu3 %v3135_v47  ;;  %v3139_v47 = vld [vmem:[%s3900_s1 + $0x510] sm:$0xff] }
  0x8a   :  { %1872 = vmatpush.bf16.msra.mxu0 %v3110_v48  ;;  %v3147_v48 = vld [vmem:[%s3900_s1 + $0x550] sm:$0xff] }
  0x8b   :  { %1885 = vmatpush.bf16.msra.mxu1 %v3118_v49 }
  0x8c   :  { %1898 = vmatpush.bf16.msra.mxu2 %v3126_v50 }
  0x8d   :  { %1911 = vmatpush.bf16.msra.mxu3 %v3134_v51  ;;  %v3155_v51 = vld [vmem:[%s3900_s1 + $0x590] sm:$0xff] }
  0x8e   :  { %1873 = vmatpush.bf16.msra.mxu0 %v3109_v52  ;;  %v3163_v52 = vld [vmem:[%s3900_s1 + $0x5d0] sm:$0xff] }
  0x8f   :  { %1886 = vmatpush.bf16.msra.mxu1 %v3117_v53  ;;  %v3138_v53 = vld [vmem:[%s3900_s1 + $0x508] sm:$0xff] }
  0x90   :  { %1899 = vmatpush.bf16.msra.mxu2 %v3125_v54  ;;  %v3146_v54 = vld [vmem:[%s3900_s1 + $0x548] sm:$0xff] }
  0x91   :  { %1912 = vmatpush.bf16.msra.mxu3 %v3133_v55  ;;  %v36_v55 = vld [vmem:[%s3901_s0 + $0x50] sm:$0xff] }
  0x92   :  { %1874 = vmatpush.bf16.msra.mxu0 %v3108_v56  ;;  %v3154_v56 = vld [vmem:[%s3900_s1 + $0x588] sm:$0xff] }
  0x93   :  { %1887 = vmatpush.bf16.msra.mxu1 %v3116_v57  ;;  %v3162_v57 = vld [vmem:[%s3900_s1 + $0x5c8] sm:$0xff] }
  0x94   :  { %1900 = vmatpush.bf16.msra.mxu2 %v3124_v58  ;;  %v37_v58 = vld [vmem:[%s3901_s0 + $0x58] sm:$0xff] }
  0x95   :  { %1913 = vmatpush.bf16.msra.mxu3 %v3132_v59 }
  0x96   :  { %1875 = vmatpush.bf16.msra.mxu0 %v3107_v60 }
  0x97   :  { %1888 = vmatpush.bf16.msra.mxu1 %v3115_v61  ;;  %v458_v61 = vunpack.c.l.b16 %v36_v55 }
  0x98   :  { %1901 = vmatpush.bf16.msra.mxu2 %v3123_v62  ;;  %v459_v62 = vunpack.c.h.b16 %v36_v55 }
  0x99   :  { %1914 = vmatpush.bf16.msra.mxu3 %v3131_v63  ;;  %v3137_v63 = vld [vmem:[%s3900_s1 + $0x500] sm:$0xff]  ;;  %v482_v5 = vpack.c.b16 %v458_v61, %v458_v61  ;;  %v3183_v61 = vld [vmem:[%s3905_s5 + $0x30] sm:$0xff] }
  0x9a   :  { %1876 = vmatpush.bf16.msra.mxu0 %v3106_v0  ;;  %v3145_v0 = vld [vmem:[%s3900_s1 + $0x540] sm:$0xff] }
  0x9b   :  { %1889 = vmatpush.bf16.msra.mxu1 %v3114_v1  ;;  %v460_v1 = vunpack.c.l.b16 %v37_v58 }
  0x9c   :  { %1902 = vmatpush.bf16.msra.mxu2 %v3122_v2  ;;  %v461_v2 = vunpack.c.h.b16 %v37_v58  ;;  %v3184_v58 = vld [vmem:[%s3905_s5 + $0x38] sm:$0xff] }
  0x9d   :  { %1915 = vmatpush.bf16.msra.mxu3 %v3130_v3  ;;  %v3153_v3 = vld [vmem:[%s3900_s1 + $0x580] sm:$0xff] }
  0x9e   :  { %1877 = vmatpush.bf16.msra.mxu0 %v3105_v6  ;;  %v1671_v31 = vpop.f32.mrf.mxu0  ;;  %v483_v6 = vpack.c.b16 %v459_v62, %v459_v62  ;;  %v485_v8 = vpack.c.b16 %v461_v2, %v461_v2  ;;  %v3181_v2 = vld [vmem:[%s3905_s5 + $0x20] sm:$0xff] }
  0x9f   :  { %1890 = vmatpush.bf16.msra.mxu1 %v3113_v7  ;;  %v1672_v34 = vadd.f32 %v3185_v28, %v1671_v31  ;;  %v1684_v35 = vpop.f32.mrf.mxu1  ;;  %v484_v7 = vpack.c.b16 %v460_v1, %v460_v1 }
  0xa0   :  { %1903 = vmatpush.bf16.msra.mxu2 %v3121_v10 }
  0xa1   :  { %1916 = vmatpush.bf16.msra.mxu3 %v3129_v11  ;;  %1878 = vmatmul.bf16.vlgmr.msra.gmra.mxu0 %v478_v18  ;;  %v1685_v38 = vadd.f32 %v1684_v35, %v1672_v34 }
  0xa2   :  { %1922 = vmatpush.bf16.msrb.mxu0 %v3144_v14  ;;  %1891 = vmatmul.bf16.vlgmr.msra.gmra.mxu1 %v479_v20 }
  0xa3   :  { %1935 = vmatpush.bf16.msrb.mxu1 %v3152_v15  ;;  %1904 = vmatmul.bf16.vlgmr.msra.gmra.mxu2 %v480_v19 }
  0xa4   :  { %1948 = vmatpush.bf16.msrb.mxu2 %v3160_v16  ;;  %1917 = vmatmul.bf16.vlgmr.msra.gmra.mxu3 %v481_v21 }
  0xa5   :  { %1961 = vmatpush.bf16.msrb.mxu3 %v3168_v17 }
  0xa6   :  { %1923 = vmatpush.bf16.msrb.mxu0 %v3143_v22  ;;  %v1697_v43 = vpop.f32.mrf.mxu2  ;;  %v1673_v46 = vpop.f32.mrf.mxu0 }
  0xa7   :  { %1936 = vmatpush.bf16.msrb.mxu1 %v3151_v23  ;;  %v1698_v44 = vadd.f32 %v1697_v43, %v1685_v38  ;;  %v1710_v45 = vpop.f32.mrf.mxu3  ;;  %v1686_v50 = vpop.f32.mrf.mxu1 }
  0xa8   :  { %1949 = vmatpush.bf16.msrb.mxu2 %v3159_v24 }
  0xa9   :  { %1962 = vmatpush.bf16.msrb.mxu3 %v3167_v25  ;;  %v1711_v49 = vadd.f32 %v1710_v45, %v1698_v44  ;;  %v3173_v44 = vld [vmem:[%s3904_s3 + $0x20] sm:$0xff]  ;;  %v3172_v45 = vld [vmem:[%s3904_s3 + $0x18] sm:$0xff] }
  0xaa   :  { %1924 = vmatpush.bf16.msrb.mxu0 %v3142_v26 }
  0xab   :  { %1937 = vmatpush.bf16.msrb.mxu1 %v3150_v27 }
  0xac   :  { %1950 = vmatpush.bf16.msrb.mxu2 %v3158_v29 }
  0xad   :  { %1963 = vmatpush.bf16.msrb.mxu3 %v3166_v30 }
  0xae   :  { %1925 = vmatpush.bf16.msrb.mxu0 %v3141_v32  ;;  %v1699_v59 = vpop.f32.mrf.mxu2 }
  0xaf   :  { %1938 = vmatpush.bf16.msrb.mxu1 %v3149_v33  ;;  %v1712_v60 = vpop.f32.mrf.mxu3 }
  0xb0   :  { %1951 = vmatpush.bf16.msrb.mxu2 %v3157_v36 }
  0xb1   :  { %1964 = vmatpush.bf16.msrb.mxu3 %v3165_v37  ;;  %v3176_v37 = vld [vmem:[%s3904_s3 + $0x38] sm:$0xff] }
  0xb2   :  { %1926 = vmatpush.bf16.msrb.mxu0 %v3140_v39 }
  0xb3   :  { %1939 = vmatpush.bf16.msrb.mxu1 %v3148_v40  ;;  %v3175_v40 = vld [vmem:[%s3904_s3 + $0x30] sm:$0xff] }
  0xb4   :  { %1952 = vmatpush.bf16.msrb.mxu2 %v3156_v41  ;;  %v3174_v41 = vld [vmem:[%s3904_s3 + $0x28] sm:$0xff] }
  0xb5   :  { %1965 = vmatpush.bf16.msrb.mxu3 %v3164_v42 }
  0xb6   :  { %1927 = vmatpush.bf16.msrb.mxu0 %v3139_v47  ;;  %v3171_v47 = vld [vmem:[%s3904_s3 + $0x10] sm:$0xff] }
  0xb7   :  { %1940 = vmatpush.bf16.msrb.mxu1 %v3147_v48 }
  0xb8   :  { %1953 = vmatpush.bf16.msrb.mxu2 %v3155_v51 }
  0xb9   :  { %1966 = vmatpush.bf16.msrb.mxu3 %v3163_v52 }
  0xba   :  { %1928 = vmatpush.bf16.msrb.mxu0 %v3138_v53 }
  0xbb   :  { %1941 = vmatpush.bf16.msrb.mxu1 %v3146_v54  ;;  %v3169_v54 = vld [vmem:[%s3904_s3] sm:$0xff] }
  0xbc   :  { %1954 = vmatpush.bf16.msrb.mxu2 %v3154_v56 }
  0xbd   :  { %1967 = vmatpush.bf16.msrb.mxu3 %v3162_v57 }
  0xbe   :  { %1929 = vmatpush.bf16.msrb.mxu0 %v3137_v63  ;;  %v1723_v9 = vpop.f32.mrf.mxu0 }
  0xbf   :  { %1942 = vmatpush.bf16.msrb.mxu1 %v3145_v0  ;;  %v1724_v10 = vadd.f32 %v1723_v9, %v1711_v49  ;;  %v1736_v11 = vpop.f32.mrf.mxu1  ;;  %v3170_v49 = vld [vmem:[%s3904_s3 + $0x8] sm:$0xff]  ;;  %v3179_v9 = vld [vmem:[%s3905_s5 + $0x10] sm:$0xff] }
  0xc0   :  { %1955 = vmatpush.bf16.msrb.mxu2 %v3153_v3  ;;  %v3182_v0 = vld [vmem:[%s3905_s5 + $0x28] sm:$0xff] }
  0xc1   :  { %1968 = vmatpush.bf16.msrb.mxu3 %v3161_v4  ;;  %1930 = vmatmul.bf16.vlgmr.msrb.gmra.mxu0 %v482_v5  ;;  %v1737_v12 = vadd.f32 %v1736_v11, %v1724_v10  ;;  %v3180_v4 = vld [vmem:[%s3905_s5 + $0x18] sm:$0xff] }
  0xc2   :  { %1943 = vmatmul.bf16.vlgmr.msrb.gmra.mxu1 %v483_v6  ;;  %2044 = vmatpush.bf16.msra.mxu0 %v3176_v37 }
  0xc3   :  { %1956 = vmatmul.bf16.vlgmr.msrb.gmra.mxu2 %v484_v7  ;;  %2127 = vmatpush.bf16.msra.mxu1 %v3184_v58 }
  0xc4   :  { %1969 = vmatmul.bf16.vlgmr.msrb.gmra.mxu3 %v485_v8 }
  0xc6   :  { %v1749_v13 = vpop.f32.mrf.mxu2  ;;  %v1725_v16 = vpop.f32.mrf.mxu0  ;;  %2045 = vmatpush.bf16.msra.mxu0 %v3175_v40 }
  0xc7   :  { %v1750_v14 = vadd.f32 %v1749_v13, %v1737_v12  ;;  %v1762_v15 = vpop.f32.mrf.mxu3  ;;  %v1738_v18 = vpop.f32.mrf.mxu1  ;;  %2128 = vmatpush.bf16.msra.mxu1 %v3183_v61 }
  0xc9   :  { %v1763_v17 = vadd.f32 %v1762_v15, %v1750_v14 }
  0xca   :  { %2046 = vmatpush.bf16.msra.mxu0 %v3174_v41 }
  0xcb   :  { %2129 = vmatpush.bf16.msra.mxu1 %v3182_v0 }
  0xce   :  { %v1751_v19 = vpop.f32.mrf.mxu2  ;;  %2047 = vmatpush.bf16.msra.mxu0 %v3173_v44 }
  0xcf   :  { %v1764_v20 = vpop.f32.mrf.mxu3  ;;  %2130 = vmatpush.bf16.msra.mxu1 %v3181_v2 }
  0xd2   :  { %2048 = vmatpush.bf16.msra.mxu0 %v3172_v45 }
  0xd3   :  { %2131 = vmatpush.bf16.msra.mxu1 %v3180_v4 }
  0xd6   :  { %2049 = vmatpush.bf16.msra.mxu0 %v3171_v47 }
  0xd7   :  { %2132 = vmatpush.bf16.msra.mxu1 %v3179_v9 }
  0xda   :  { %2050 = vmatpush.bf16.msra.mxu0 %v3170_v49 }
  0xde   :  { %v1775_v21 = vpop.f32.mrf.mxu0  ;;  %2051 = vmatpush.bf16.msra.mxu0 %v3169_v54 }
  0xdf   :  { %v1776_v22 = vadd.f32 %v1775_v21, %v1763_v17  ;;  %v1788_v23 = vpop.f32.mrf.mxu1  ;;  %v3178_v21 = vld [vmem:[%s3905_s5 + $0x8] sm:$0xff] }
  0xe0   :  { %2133 = vmatpush.bf16.msra.mxu1 %v3178_v21 }
  0xe1   :  { %v1789_v24 = vadd.f32 %v1788_v23, %v1776_v22  ;;  %v3177_v22 = vld [vmem:[%s3905_s5] sm:$0xff] }
  0xe2   :  { %v3186_v23 = vld [vmem:[%s3903_s4] ss:$0 sm:$0xff] }
  0xe4   :  { %2134 = vmatpush.bf16.msra.mxu1 %v3177_v22 }
  0xe6   :  { %v1801_v25 = vpop.f32.mrf.mxu2  ;;  %v1777_v28 = vpop.f32.mrf.mxu0 }
  0xe7   :  { %v1802_v26 = vadd.f32 %v1801_v25, %v1789_v24  ;;  %v1814_v27 = vpop.f32.mrf.mxu3  ;;  %v1790_v30 = vpop.f32.mrf.mxu1 }
  0xe9   :  { %v1815_v29 = vadd.f32 %v1814_v27, %v1802_v26 }
  0xee   :  { %v1803_v31 = vpop.f32.mrf.mxu2 }
  0xef   :  { %v1816_v32 = vpop.f32.mrf.mxu3 }
  0xfe   :  { %v1827_v33 = vpop.f32.mrf.mxu0 }
  0xff   :  { %v1840_v34 = vpop.f32.mrf.mxu1  ;;  %v1828_v51 = vadd.f32 %v1827_v33, %v1815_v29  ;;  %v3187_v29 = vld [vmem:[%s3906_s6] ss:$0 sm:$0xff] }
 0x101   :  { %v1841_v56 = vadd.f32 %v1840_v34, %v1828_v51 }
 0x106   :  { %v1853_v35 = vpop.f32.mrf.mxu2  ;;  %v1829_v38 = vpop.f32.mrf.mxu0 }
 0x107   :  { %v1866_v36 = vpop.f32.mrf.mxu3  ;;  %v1842_v39 = vpop.f32.mrf.mxu1  ;;  %v1854_v57 = vadd.f32 %v1853_v35, %v1841_v56 }
 0x109   :  { %v1867_v62 = vadd.f32 %v1866_v36, %v1854_v57 }
 0x10e   :  { %v1855_v42 = vpop.f32.mrf.mxu2 }
 0x10f   :  { %v1868_v43 = vpop.f32.mrf.mxu3 }
 0x11e   :  { %v1879_v46 = vpop.f32.mrf.mxu0 }
 0x11f   :  { %v1892_v48 = vpop.f32.mrf.mxu1  ;;  %v1880_v63 = vadd.f32 %v1879_v46, %v1867_v62 }
 0x121   :  { %v1893_v1 = vadd.f32 %v1892_v48, %v1880_v63 }
 0x126   :  { %v1905_v50 = vpop.f32.mrf.mxu2  ;;  %v1881_v53 = vpop.f32.mrf.mxu0 }
 0x127   :  { %v1918_v52 = vpop.f32.mrf.mxu3  ;;  %v1894_v55 = vpop.f32.mrf.mxu1  ;;  %v1906_v3 = vadd.f32 %v1905_v50, %v1893_v1 }
 0x129   :  { %v1919_v5 = vadd.f32 %v1918_v52, %v1906_v3 }
 0x12e   :  { %v1907_v59 = vpop.f32.mrf.mxu2 }
 0x12f   :  { %v1920_v60 = vpop.f32.mrf.mxu3 }
 0x13e   :  { %v1931_v6 = vpop.f32.mrf.mxu0 }
 0x13f   :  { %v1944_v7 = vpop.f32.mrf.mxu1  ;;  %v1932_v8 = vadd.f32 %v1931_v6, %v1919_v5 }
 0x141   :  { %v1945_v10 = vadd.f32 %v1944_v7, %v1932_v8 }
 0x146   :  { %v1957_v11 = vpop.f32.mrf.mxu2  ;;  %v1933_v14 = vpop.f32.mrf.mxu0 }
 0x147   :  { %v1970_v12 = vpop.f32.mrf.mxu3  ;;  %v1958_v13 = vadd.f32 %v1957_v11, %v1945_v10  ;;  %v1946_v15 = vpop.f32.mrf.mxu1 }
 0x149   :  { %v1971_v16 = vadd.f32 %v1970_v12, %v1958_v13 }
 0x14b   :  { %v1974_v17 = vmax.f32 %v1971_v16, 0.0 }
 0x14d   :  { %v1975_v18 = vpack.c.bf16 %v1974_v17, %v1974_v17 }
 0x14e   :  { %v1959_v19 = vpop.f32.mrf.mxu2 }
 0x14f   :  { %v1972_v20 = vpop.f32.mrf.mxu3  ;;  %2052 = vmatmul.bf16.vlgmr.msra.gmra.mxu0 %v1975_v18 }
 0x1cc   :  { %v2053_v24 = vpop.f32.mrf.mxu0 }
 0x1cd   :  { %v2054_v25 = vadd.f32 %v3186_v23, %v2053_v24 }
 0x1cf   :  { %v2057_v26 = vmax.f32 %v2054_v25, 0.0 }
 0x1d1   :  { %v2058_v27 = vpack.c.bf16 %v2057_v26, %v2057_v26 }
 0x1d3   :  { %2135 = vmatmul.bf16.vlgmr.msra.gmra.mxu1 %v2058_v27 }
 0x1d4   :  { %v2055_v28 = vpop.f32.mrf.mxu0 }
 0x250   :  { %v2136_v30 = vpop.f32.mrf.mxu1 }
 0x251   :  { %v2137_v31 = vadd.f32 %v3187_v29, %v2136_v30 }
 0x253   :  { %2140 = vst [vmem:[%s3907_s7] sm:$0xff] %v2137_v31 }
 0x258   :  { %v2138_v32 = vpop.f32.mrf.mxu1 }

</bundles_post_ra>
